<compile_context>
chip_gen: v5e
topology: v5e:2x2
jax: 0.10.0
libtpu: 0.0.40
codegen_flags: <defaults>
</compile_context>

<pallas_src>
import functools

import numpy as np
import jax
import jax.numpy as jnp
from jax import lax
from jax.experimental import pallas as pl
from jax.experimental.pallas import tpu as pltpu


def _neighbor_prev(x, k, axis):
    """y[..., i, ...] = x[..., i-k, ...] along `axis`, zero-filled at the edge."""
    size = x.shape[axis]
    zshape = list(x.shape)
    zshape[axis] = k
    zeros = jnp.zeros(zshape, x.dtype)
    kept = lax.slice_in_dim(x, 0, size - k, axis=axis)
    return lax.concatenate([zeros, kept], dimension=axis)


def _neighbor_next(x, k, axis):
    """y[..., i, ...] = x[..., i+k, ...] along `axis`, zero-filled at the edge."""
    size = x.shape[axis]
    zshape = list(x.shape)
    zshape[axis] = k
    zeros = jnp.zeros(zshape, x.dtype)
    kept = lax.slice_in_dim(x, k, size, axis=axis)
    return lax.concatenate([kept, zeros], dimension=axis)


def _box3d_kernel(scale_ref, x_ref, o_ref, *, D: int, H: int, W: int):
    """One grid step: separable 3x3x3 box sum over an (R, HWp) slab, then scale.

    scale_ref : (1,) f32 in SMEM  -- the uniform per-tap conv weight (1/27).
    x_ref     : (R, HWp) input slab; R = bn*D depth planes, lane axis = padded H*W.
    o_ref     : (R, HWp) output slab.
    """
    R, HWp = x_ref.shape
    x = x_ref[...].astype(jnp.float32)

    # Small boundary-mask vectors (0/1 floats); they broadcast in the multiply,
    # so no full (R, HWp) index grids are ever materialized.
    lane = lax.broadcasted_iota(jnp.int32, (1, HWp), 1)      # flattened h*W + w
    wi = lane % W                                            # w within a W-row

    s = x

    # ---- W pass: x[w-1] + x[w] + x[w+1], zero outside each W-row ----------
    if W > 1:
        has_wm1 = jnp.where(wi == 0, 0.0, 1.0)               # (1, HWp) f32
        has_wp1 = jnp.where(wi == W - 1, 0.0, 1.0)
        s = x + has_wm1 * _neighbor_prev(x, 1, axis=1) \
              + has_wp1 * _neighbor_next(x, 1, axis=1)

    # ---- H pass: shift by +-W lanes inside each depth plane ---------------
    if H > 1:
        has_hm1 = jnp.where(lane < W, 0.0, 1.0)              # first h-row
        has_hp1 = jnp.where(lane >= (H - 1) * W, 0.0, 1.0)   # last h-row (+ pad)
        s = s + has_hm1 * _neighbor_prev(s, W, axis=1) \
              + has_hp1 * _neighbor_next(s, W, axis=1)

    # ---- D pass: shift by +-1 plane along the sublane (row) axis ----------
    if D > 1:
        row = lax.broadcasted_iota(jnp.int32, (R, 1), 0)
        di = row % D                                         # d within a batch elt
        has_dm1 = jnp.where(di == 0, 0.0, 1.0)               # (R, 1) f32
        has_dp1 = jnp.where(di == D - 1, 0.0, 1.0)
        s = s + has_dm1 * _neighbor_prev(s, 1, axis=0) \
              + has_dp1 * _neighbor_next(s, 1, axis=0)

    # Uniform kernel => a single multiply by the per-tap weight at the end.
    o_ref[...] = (scale_ref[0] * s).astype(o_ref.dtype)


def _pick_batch_block(n, d, per_batch_bytes, sublane, budget=4 << 20):
    """How many batch elements to fold into one grid step (row block = bn*d).

    Keeps the row block a multiple of the sublane tile (or full extent),
    keeps >= 2 grid steps when N >= 2 (v7x shards 'parallel' axes over 2 TCs),
    and grows the per-step block toward `budget` to amortize grid overhead.
    """
    candidates = [b for b in range(1, n + 1)
                  if n % b == 0 and ((b * d) % sublane == 0 or b == n)]
    multi = [b for b in candidates if n // b >= 2]
    pool = multi if multi else candidates
    fitting = [b for b in pool if b * per_batch_bytes <= budget]
    return max(fitting) if fitting else min(pool)


def aggregate_sum(x, weight):
    """x: (N, 1, D, H, W); weight: (1, 1, 3, 3, 3) with all taps equal (1/27).

    Equivalent to torch.nn.functional.conv3d(x, weight, padding=1) for the
    AggregateSum module: a separable 3-D box sum scaled once by the per-tap
    weight (the conv kernel is constant and uniform by construction).
    """
    N, C, D, H, W = x.shape
    assert C == 1, "AggregateSum expects a single input channel"
    assert weight.shape == (1, 1, 3, 3, 3), "module uses kernel_size=3"

    # The separable formulation relies on the kernel being uniform; verify
    # whenever the weight is concrete (skipped silently under tracing).
    try:
        w_np = np.asarray(weight, dtype=np.float32).reshape(-1)
        if not np.allclose(w_np, w_np[0]):
            raise ValueError("AggregateSum weight must have all taps equal")
    except jax.errors.ConcretizationTypeError:
        pass  # traced weight: uniformity assumed (true for this module)

    HW = H * W
    HWp = ((HW + 127) // 128) * 128             # lane-dense, unmasked stores
    itemsize = x.dtype.itemsize
    sublane = max(8, 32 // itemsize)            # 8 for f32, 16 for bf16, ...

    xs = x.reshape(N * D, HW)
    if HWp != HW:
        xs = jnp.pad(xs, ((0, 0), (0, HWp - HW)))   # pad lanes never leak back
    scale = weight.reshape(-1)[:1].astype(jnp.float32)   # (1,) per-tap weight

    per_batch_bytes = D * HWp * itemsize
    bn = _pick_batch_block(N, D, per_batch_bytes, sublane)
    R = bn * D
    grid = (N // bn,)

    # Scoped-VMEM limit: generation aware (128 MiB on v5e/v6e, 64 MiB on v7x),
    # at least the 32 MiB default, capped at 75% of physical for headroom.
    try:
        vmem_cap = int(getattr(pltpu.get_tpu_info(), "vmem_capacity_bytes",
                               64 * 1024 * 1024))
    except Exception:  # no TPU visible at trace time (e.g. interpret mode)
        vmem_cap = 64 * 1024 * 1024
    block_bytes = 2 * R * HWp * itemsize        # double-buffered in + out tile
    vmem_limit = int(min(3 * vmem_cap // 4,
                         max(32 * 1024 * 1024, 4 * block_bytes)))

    out = pl.pallas_call(
        functools.partial(_box3d_kernel, D=D, H=H, W=W),
        out_shape=jax.ShapeDtypeStruct((N * D, HWp), x.dtype),
        grid=grid,
        in_specs=[
            pl.BlockSpec(memory_space=pltpu.MemorySpace.SMEM),   # scale (1,)
            pl.BlockSpec((R, HWp), lambda i: (i, 0)),            # input slab
        ],
        out_specs=pl.BlockSpec((R, HWp), lambda i: (i, 0)),
        compiler_params=pltpu.CompilerParams(
            dimension_semantics=("parallel",),
            vmem_limit_bytes=vmem_limit,
        ),
    )(scale, xs)

    if HWp != HW:
        out = out[:, :HW]
    return out.reshape(N, 1, D, H, W)


if __name__ == "__main__":
    key = jax.random.PRNGKey(0)

    # Deterministic parameters exactly as AggregateSum.__init__:
    # ones kernel normalized by its sum -> every tap = 1/27.
    kernel_size = 3
    weight = jnp.ones((1, 1, kernel_size, kernel_size, kernel_size), jnp.float32)
    weight = weight / jnp.sum(weight)

    # Small input consistent with conv3d(in_channels=1): (N, C, D, H, W).
    x = jax.random.normal(key, (2, 1, 8, 16, 16), dtype=jnp.float32)

    y = jax.block_until_ready(aggregate_sum(x, weight))

    # Reference: plain XLA conv3d with identical weights / padding.
    y_ref = lax.conv_general_dilated(
        x, weight, window_strides=(1, 1, 1),
        padding=((1, 1), (1, 1), (1, 1)),
        dimension_numbers=("NCDHW", "OIDHW", "NCDHW"))

    assert y.shape == x.shape
    assert jnp.allclose(y, y_ref, atol=1e-5, rtol=1e-5), "mismatch vs reference conv3d"

    print("KERNEL_OK")
</pallas_src>

<mosaic_0001>
module attributes {stable_mosaic.version = 11 : i64} {
  func.func @_box3d_kernel(%arg0: i32, %arg1: memref<1xf32, #tpu.memory_space<smem>>, %arg2: memref<8x256xf32, #tpu.memory_space<vmem>>, %arg3: memref<8x256xf32, #tpu.memory_space<vmem>>) attributes {dimension_semantics = [#tpu.dimension_semantics<parallel>], iteration_bounds = array<i64: 2>, scalar_prefetch = 0 : i64, scratch_operands = 0 : i64, tpu.core_type = #tpu.core_type<tc>, window_params = [{transform_indices = @transform_0, window_bounds = array<i64: 1>}, {transform_indices = @transform_1, window_bounds = array<i64: 8, 256>}, {transform_indices = @transform_2, window_bounds = array<i64: 8, 256>}]} {
    %c0 = arith.constant 0 : index
    %c0_0 = arith.constant 0 : index
    %0 = vector.load %arg2[%c0, %c0_0] : memref<8x256xf32, #tpu.memory_space<vmem>>, vector<8x256xf32>
    %1 = tpu.iota {dimensions = array<i32: 1>} : vector<1x256xi32>
    %c16_i32 = arith.constant 16 : i32
    %c0_i32 = arith.constant 0 : i32
    %2 = arith.cmpi eq, %c16_i32, %c0_i32 : i32
    %c1_i32 = arith.constant 1 : i32
    %3 = arith.select %2, %c1_i32, %c16_i32 : i32
    %4 = vector.broadcast %3 : i32 to vector<1x256xi32>
    %5 = arith.remsi %1, %4 : vector<1x256xi32>
    %c0_i32_1 = arith.constant 0 : i32
    %6 = vector.broadcast %c0_i32_1 : i32 to vector<1x256xi32>
    %7 = arith.cmpi ne, %5, %6 : vector<1x256xi32>
    %c0_i32_2 = arith.constant 0 : i32
    %8 = vector.broadcast %c0_i32_2 : i32 to vector<1x256xi32>
    %9 = arith.cmpi slt, %5, %8 : vector<1x256xi32>
    %c0_i32_3 = arith.constant 0 : i32
    %10 = arith.cmpi slt, %3, %c0_i32_3 : i32
    %11 = vector.broadcast %10 : i1 to vector<1x256xi1>
    %12 = vector.broadcast %11 : vector<1x256xi1> to vector<1x256xi1>
    %13 = arith.xori %9, %12 : vector<1x256xi1>
    %14 = arith.andi %13, %7 : vector<1x256xi1>
    %15 = vector.broadcast %3 : i32 to vector<1x256xi32>
    %16 = arith.addi %5, %15 : vector<1x256xi32>
    %17 = arith.select %14, %16, %5 : vector<1x256xi1>, vector<1x256xi32>
    %c0_i32_4 = arith.constant 0 : i32
    %18 = vector.broadcast %c0_i32_4 : i32 to vector<1x256xi32>
    %19 = arith.cmpi eq, %17, %18 : vector<1x256xi32>
    %cst = arith.constant 0.000000e+00 : f32
    %cst_5 = arith.constant 1.000000e+00 : f32
    %20 = vector.broadcast %cst : f32 to vector<1x256xf32>
    %21 = vector.broadcast %cst_5 : f32 to vector<1x256xf32>
    %22 = arith.select %19, %20, %21 : vector<1x256xi1>, vector<1x256xf32>
    %c15_i32 = arith.constant 15 : i32
    %23 = vector.broadcast %c15_i32 : i32 to vector<1x256xi32>
    %24 = arith.cmpi eq, %17, %23 : vector<1x256xi32>
    %cst_6 = arith.constant 0.000000e+00 : f32
    %cst_7 = arith.constant 1.000000e+00 : f32
    %25 = vector.broadcast %cst_6 : f32 to vector<1x256xf32>
    %26 = vector.broadcast %cst_7 : f32 to vector<1x256xf32>
    %27 = arith.select %24, %25, %26 : vector<1x256xi1>, vector<1x256xf32>
    %cst_8 = arith.constant 0.000000e+00 : f32
    %28 = vector.broadcast %cst_8 : f32 to vector<8x1xf32>
    %29 = vector.extract_strided_slice %0 {offsets = [0, 0], sizes = [8, 255], strides = [1, 1]} : vector<8x256xf32> to vector<8x255xf32>
    %30 = tpu.concatenate %28, %29 in 1 : vector<8x1xf32>, vector<8x255xf32> -> vector<8x256xf32>
    %31 = vector.broadcast %22 : vector<1x256xf32> to vector<8x256xf32>
    %32 = arith.mulf %31, %30 : vector<8x256xf32>
    %33 = arith.addf %0, %32 : vector<8x256xf32>
    %cst_9 = arith.constant 0.000000e+00 : f32
    %34 = vector.broadcast %cst_9 : f32 to vector<8x1xf32>
    %35 = vector.extract_strided_slice %0 {offsets = [0, 1], sizes = [8, 255], strides = [1, 1]} : vector<8x256xf32> to vector<8x255xf32>
    %36 = tpu.concatenate %35, %34 in 1 : vector<8x255xf32>, vector<8x1xf32> -> vector<8x256xf32>
    %37 = vector.broadcast %27 : vector<1x256xf32> to vector<8x256xf32>
    %38 = arith.mulf %37, %36 : vector<8x256xf32>
    %39 = arith.addf %33, %38 : vector<8x256xf32>
    %c16_i32_10 = arith.constant 16 : i32
    %40 = vector.broadcast %c16_i32_10 : i32 to vector<1x256xi32>
    %41 = arith.cmpi slt, %1, %40 : vector<1x256xi32>
    %cst_11 = arith.constant 0.000000e+00 : f32
    %cst_12 = arith.constant 1.000000e+00 : f32
    %42 = vector.broadcast %cst_11 : f32 to vector<1x256xf32>
    %43 = vector.broadcast %cst_12 : f32 to vector<1x256xf32>
    %44 = arith.select %41, %42, %43 : vector<1x256xi1>, vector<1x256xf32>
    %c240_i32 = arith.constant 240 : i32
    %45 = vector.broadcast %c240_i32 : i32 to vector<1x256xi32>
    %46 = arith.cmpi sge, %1, %45 : vector<1x256xi32>
    %cst_13 = arith.constant 0.000000e+00 : f32
    %cst_14 = arith.constant 1.000000e+00 : f32
    %47 = vector.broadcast %cst_13 : f32 to vector<1x256xf32>
    %48 = vector.broadcast %cst_14 : f32 to vector<1x256xf32>
    %49 = arith.select %46, %47, %48 : vector<1x256xi1>, vector<1x256xf32>
    %cst_15 = arith.constant 0.000000e+00 : f32
    %50 = vector.broadcast %cst_15 : f32 to vector<8x16xf32>
    %51 = vector.extract_strided_slice %39 {offsets = [0, 0], sizes = [8, 240], strides = [1, 1]} : vector<8x256xf32> to vector<8x240xf32>
    %52 = tpu.concatenate %50, %51 in 1 : vector<8x16xf32>, vector<8x240xf32> -> vector<8x256xf32>
    %53 = vector.broadcast %44 : vector<1x256xf32> to vector<8x256xf32>
    %54 = arith.mulf %53, %52 : vector<8x256xf32>
    %55 = arith.addf %39, %54 : vector<8x256xf32>
    %cst_16 = arith.constant 0.000000e+00 : f32
    %56 = vector.broadcast %cst_16 : f32 to vector<8x16xf32>
    %57 = vector.extract_strided_slice %39 {offsets = [0, 16], sizes = [8, 240], strides = [1, 1]} : vector<8x256xf32> to vector<8x240xf32>
    %58 = tpu.concatenate %57, %56 in 1 : vector<8x240xf32>, vector<8x16xf32> -> vector<8x256xf32>
    %59 = vector.broadcast %49 : vector<1x256xf32> to vector<8x256xf32>
    %60 = arith.mulf %59, %58 : vector<8x256xf32>
    %61 = arith.addf %55, %60 : vector<8x256xf32>
    %62 = tpu.iota {dimensions = array<i32: 0>} : vector<8x1xi32>
    %c8_i32 = arith.constant 8 : i32
    %c0_i32_17 = arith.constant 0 : i32
    %63 = arith.cmpi eq, %c8_i32, %c0_i32_17 : i32
    %c1_i32_18 = arith.constant 1 : i32
    %64 = arith.select %63, %c1_i32_18, %c8_i32 : i32
    %65 = vector.broadcast %64 : i32 to vector<8x1xi32>
    %66 = arith.remsi %62, %65 : vector<8x1xi32>
    %c0_i32_19 = arith.constant 0 : i32
    %67 = vector.broadcast %c0_i32_19 : i32 to vector<8x1xi32>
    %68 = arith.cmpi ne, %66, %67 : vector<8x1xi32>
    %c0_i32_20 = arith.constant 0 : i32
    %69 = vector.broadcast %c0_i32_20 : i32 to vector<8x1xi32>
    %70 = arith.cmpi slt, %66, %69 : vector<8x1xi32>
    %c0_i32_21 = arith.constant 0 : i32
    %71 = arith.cmpi slt, %64, %c0_i32_21 : i32
    %72 = vector.broadcast %71 : i1 to vector<8x1xi1>
    %73 = vector.broadcast %72 : vector<8x1xi1> to vector<8x1xi1>
    %74 = arith.xori %70, %73 : vector<8x1xi1>
    %75 = arith.andi %74, %68 : vector<8x1xi1>
    %76 = vector.broadcast %64 : i32 to vector<8x1xi32>
    %77 = arith.addi %66, %76 : vector<8x1xi32>
    %78 = arith.select %75, %77, %66 : vector<8x1xi1>, vector<8x1xi32>
    %c0_i32_22 = arith.constant 0 : i32
    %79 = vector.broadcast %c0_i32_22 : i32 to vector<8x1xi32>
    %80 = arith.cmpi eq, %78, %79 : vector<8x1xi32>
    %cst_23 = arith.constant 0.000000e+00 : f32
    %cst_24 = arith.constant 1.000000e+00 : f32
    %81 = vector.broadcast %cst_23 : f32 to vector<8x1xf32>
    %82 = vector.broadcast %cst_24 : f32 to vector<8x1xf32>
    %83 = arith.select %80, %81, %82 : vector<8x1xi1>, vector<8x1xf32>
    %c7_i32 = arith.constant 7 : i32
    %84 = vector.broadcast %c7_i32 : i32 to vector<8x1xi32>
    %85 = arith.cmpi eq, %78, %84 : vector<8x1xi32>
    %cst_25 = arith.constant 0.000000e+00 : f32
    %cst_26 = arith.constant 1.000000e+00 : f32
    %86 = vector.broadcast %cst_25 : f32 to vector<8x1xf32>
    %87 = vector.broadcast %cst_26 : f32 to vector<8x1xf32>
    %88 = arith.select %85, %86, %87 : vector<8x1xi1>, vector<8x1xf32>
    %cst_27 = arith.constant 0.000000e+00 : f32
    %89 = vector.broadcast %cst_27 : f32 to vector<1x256xf32>
    %90 = vector.extract_strided_slice %61 {offsets = [0, 0], sizes = [7, 256], strides = [1, 1]} : vector<8x256xf32> to vector<7x256xf32>
    %91 = tpu.concatenate %89, %90 in 0 : vector<1x256xf32>, vector<7x256xf32> -> vector<8x256xf32>
    %92 = vector.broadcast %83 : vector<8x1xf32> to vector<8x256xf32>
    %93 = arith.mulf %92, %91 : vector<8x256xf32>
    %94 = arith.addf %61, %93 : vector<8x256xf32>
    %cst_28 = arith.constant 0.000000e+00 : f32
    %95 = vector.broadcast %cst_28 : f32 to vector<1x256xf32>
    %96 = vector.extract_strided_slice %61 {offsets = [1, 0], sizes = [7, 256], strides = [1, 1]} : vector<8x256xf32> to vector<7x256xf32>
    %97 = tpu.concatenate %96, %95 in 0 : vector<7x256xf32>, vector<1x256xf32> -> vector<8x256xf32>
    %98 = vector.broadcast %88 : vector<8x1xf32> to vector<8x256xf32>
    %99 = arith.mulf %98, %97 : vector<8x256xf32>
    %100 = arith.addf %94, %99 : vector<8x256xf32>
    %c0_29 = arith.constant 0 : index
    %101 = memref.load %arg1[%c0_29] : memref<1xf32, #tpu.memory_space<smem>>
    %102 = vector.broadcast %101 : f32 to vector<8x256xf32>
    %103 = arith.mulf %102, %100 : vector<8x256xf32>
    %c0_30 = arith.constant 0 : index
    %c0_31 = arith.constant 0 : index
    %104 = vector.load %arg3[%c0_30, %c0_31] : memref<8x256xf32, #tpu.memory_space<vmem>>, vector<8x256xf32>
    tpu.vector_store %arg3[%c0_30, %c0_31], %103 {strides = array<i32>} : memref<8x256xf32, #tpu.memory_space<vmem>>, vector<8x256xf32>,
    return
  }
  func.func @transform_0(%arg0: i32) -> i32 {
    %c0_i32 = arith.constant 0 : i32
    %c0_i32_0 = arith.constant 0 : i32
    return %c0_i32 : i32
  }
  func.func @transform_1(%arg0: i32) -> (i32, i32) {
    %c0_i32 = arith.constant 0 : i32
    %c0_i32_0 = arith.constant 0 : i32
    return %arg0, %c0_i32 : i32, i32
  }
  func.func @transform_2(%arg0: i32) -> (i32, i32) {
    %c0_i32 = arith.constant 0 : i32
    %c0_i32_0 = arith.constant 0 : i32
    return %arg0, %c0_i32 : i32, i32
  }
}

</mosaic_0001>

<bundles_post_ra>
// kernel: tpu_custom_call.1
= control target key start
LH: loop header
LB: loop body
LE: loop exit
PB: predicated region body
PF: predicated region fallthrough
CT: control target
= control target key end

     0   :  { %s723_s0 = inlined_call_operand.<no memory space> [shape: f32[1], index: 0, kind: input, shape index: {}]   ;;  %s724_s1 = inlined_call_operand.hbm [shape: f32[16,256], index: 1, kind: input, shape index: {}]   ;;  %s725_s2 = inlined_call_operand.hbm [shape: f32[16,256], index: 2, kind: output, shape index: {}]  }
   0x1   :  { %7 = sst [smem:[#allocation2]] %s723_s0 }
   0x2   :  { %8 = vsyncpa [#allocation4], 0 }
   0x3   :  { %10 = vsyncpa [#allocation4 + $0x1], 0 }
   0x4   :  { %11 = vsyncpa [#allocation5], 0 }
   0x5   :  { %13 = vsyncpa [#allocation5 + $0x1], 0  ;;  %s587_s11 = smov 0   ;;  %s589_s12 = smov 0  }
   0x6   :  { %s591_s13 = smov 0   ;;  %s593_s14 = smov 0  }
   0x7 LB: > { %s608_s0 = sadd.s32 4294967295, %s562_s14   ;;  %s399_s15 = sadd.s32 4294967294, %s562_s14   ;;  %s562_s14 = sphi %s593_s14, %s735_s14   ;;  %s558_s13 = sphi %s591_s13, %s734_s13   ;;  %s554_s12 = sphi %s589_s12, %s733_s12   ;;  %s550_s11 = sphi %s587_s11, %s732_s11  }
   0x8   : > { %s612_s16 = sadd.s32 1, %s562_s14   ;;  %s47_s17 = sadd.s32 1, %s558_s13 }
   0x9   : > { %s44_s18 = ssub.s32 %s562_s14, %s612_s16  ;;  %p54_p0 = scmp.ne.s32.totalorder %s558_s13, %s554_s12 }
   0xa   : > { %p45_p1 = scmp.eq.s32.totalorder %s44_s18, 0  ;;  %p55_p2 = scmp.eq.s32.totalorder %s562_s14, 0 }
   0xb   : > { %p60_p3 = scmp.ne.s32.totalorder %s554_s12, %s550_s11  ;;  %p61_p4 = scmp.eq.s32.totalorder %s608_s0, 0 }
   0xc   : > { %s624_s19 = scalar_select %p45_p1, %s558_s13, %s47_s17  }
   0xd   : > { %p626_p5 = por %p55_p2, %p54_p0  ;;  %p630_p6 = por %p61_p4, %p60_p3 }
   0xe   : > { %p84_p7 = scmp.eq.s32.totalorder %s608_s0, 1  ;;  %p90_p8 = scmp.eq.s32.totalorder %s399_s15, 1 }
   0xf   : > { %p427_p10 = scmp.lt.s32.totalorder %s562_s14, 2  ;;  %s113_s24 = sand.u32 1, %s558_s13  }
  0x10   : > { %p637_p11 = por %p84_p7, %p54_p0  ;;  %p641_p12 = por %p90_p8, %p60_p3 }
  0x11   : > { %s413_s25 = sshll.u32 %s562_s14, 4  ;;  %s402_s26 = sshll.u32 %s113_s24, 4 }
  0x12   : > { %s122_s29 = scalar_lea.hbm %s724_s1, %s413_s25  ;;  %s117_s3 = scalar_lea.vmem [#allocation3], %s402_s26 }
  0x13   : > { %s124_s30 = sshll.u32 %s122_s29, 4  ;;  %s126_s4 = sshll.u32 %s117_s3, 4  ;;  %s125_s30 = int_to_ptr.hbm [resolvable:$true] %s124_s30  ;;  %s127_s4 = int_to_ptr.vmem [resolvable:$true] %s126_s4 }
  0x14   : > { %p652_p13 = pnand %p427_p10, %p626_p5  ;;  %p405_p0 = scmp.ge.s32.totalorder %s562_s14, 1 }
  0x15   : > { %p131_p1 = scmp.lt.s32.totalorder %s562_s14, 3  ;;  %s114_s6 = scalar_lea.sflag [#allocation4], %s113_s24 }
  0x16   : > { %s466_s7 = sshra.s32 %s125_s30, 4  ;;  %p470_p3 = pneg %p652_p13  ;;  %s467_s7 = int_to_ptr.hbm [resolvable:$true] %s466_s7 }
  0x17   : > { %s468_s8 = scalar_lea.hbm %s467_s7, 16  ;;  %s473_s15 = scalar_lea.hbm %s724_s1, 32 }
  0x18   : > { %p469_p2 = scmp.ne.s32.totalorder %s467_s7, %s468_s8  ;;  %p474_p5 = scmp.lt.s32.totalorder %s467_s7, %s724_s1 }
  0x19   : > { %p475_p8 = scmp.lt.s32.totalorder %s473_s15, %s468_s8 }
  0x1a   : > { %p471_p4 = pnand %p470_p3, %p469_p2 }
  0x1b   : > { %p476_p10 = por %p475_p8, %p474_p5 }
  0x1c   : > { %p472_p7 = pneg %p471_p4 }
  0x1e   : > { %p477_p9 = pnand %p476_p10, %p472_p7 }
  0x20   : > { %480 = shalt.err (!%p477_p9)
}
  0x21   : > { %422 = dma.hbm_to_vmem [thread:$0]  (!%p652_p13), %s125_s30, 256, %s127_s4, %s114_s6  }
  0x22   : > { %p132_p2 = pnand %p405_p0, %p131_p1 }
  0x23   : > { %s673_s20 = sand.u32 (!%p132_p2), 1, %s554_s12  }
  0x24   : > { %135 = sbr.rel (%p132_p2) target bundleno = 307 (0x133), region = 28  ;;  %s406_s24 = sshll.u32 (!%p132_p2), %s673_s20, 4 }
  0x25   : > { %s138_s25 = scalar_lea.sflag (!%p132_p2), [#allocation4], %s673_s20  ;;  %s141_s26 = scalar_lea.vmem (!%p132_p2), [#allocation3], %s406_s24 }
  0x29   : > { %541 = dma.done.wait (%p630_p6), %s138_s25, 256  }
  0x2a   : > { %543 = vsyncadd (%p630_p6), %s138_s25, 4294967040  ;;  %v163_v0 = vld [vmem:[%s141_s26] sm:$0xff]  ;;  %s564_s27 = smov 127   ;;  %s565_s28 = smov 1   ;;  %v164_v1 = vld [vmem:[%s141_s26 + $0x8] sm:$0xff]  ;;  %v165_v2 = vlaneseq  ;;  %vm206_vm1 = vcmask 7168  }
  0x2b   : > { %215 = vrot.lane.b32.xlu1 %v163_v0, %s564_s27  ;;  %202 = vrot.lane.b32.xlu0 %v163_v0, %s565_s28  ;;  %v566_v9 = vmov 1.0   ;;  %vm219_vm5 = vcmask 1039360   ;;  %s567_s21 = smov 112   ;;  %s568_s29 = smov 16   ;;  %vm242_vm7 = vcmask 130048   ;;  %vm255_vm9 = vcmask 916480  }
  0x2c   : > { %v166_v3 = vand.u32 127, %v165_v2  ;;  %v265_v31 = vshrl.u32 %v165_v2, 7  ;;  %s685_s30 = sld [smem:[#allocation2]]  ;;  %vm288_vm12 = vcmask 1040384   ;;  %vm299_vm13 = vcmask 1046528   ;;  %s414_s3 = sshll.u32 %s608_s0, 4 }
  0x2d   : > { %s324_s6 = scalar_lea.hbm %s725_s2, %s414_s3  ;;  %s162_s7 = scalar_lea.vmem [#allocation6], %s406_s24 }
  0x2e   : > { %v172_v4 = vand.u32 15, %v166_v3  ;;  %v167_v5 = vadd.s32 128, %v166_v3  ;;  %vm228_vm6 = vcmp.lt.s32.totalorder %v166_v3, 16  ;;  %v270_v34 = vand.u32 7, %v265_v31  ;;  %s326_s8 = sshll.u32 %s162_s7, 4  ;;  %s328_s0 = sshll.u32 %s324_s6, 4  ;;  %s327_s8 = int_to_ptr.vmem [resolvable:$true] %s326_s8  ;;  %s329_s0 = int_to_ptr.hbm [resolvable:$true] %s328_s0 }
  0x2f   : > { %v230_v29 = vsel %vm228_vm6, 0.0, %v566_v9  ;;  %s313_s9 = scalar_lea.sflag [#allocation5], %s673_s20  ;;  %s510_s10 = sshra.s32 %s329_s0, 4  ;;  %s511_s10 = int_to_ptr.hbm [resolvable:$true] %s510_s10 }
  0x30   : > { %vm192_vm0 = vcmp.eq.s32.totalorder %v172_v4, 0  ;;  %v179_v8 = vand.u32 15, %v167_v5  ;;  %vm196_vm2 = vcmp.eq.s32.totalorder %v172_v4, 15  ;;  %vm233_vm8 = vcmp.ge.s32.totalorder %v167_v5, 240  ;;  %s512_s15 = scalar_lea.hbm %s511_s10, 16  ;;  %s516_s24 = scalar_lea.hbm %s725_s2, 32 }
  0x31   : > { %v194_v10 = vsel %vm192_vm0, 0.0, %v566_v9  ;;  %v198_v13 = vsel %vm196_vm2, 0.0, %v566_v9  ;;  %v235_v36 = vsel %vm233_vm8, 0.0, %v566_v9  ;;  %vm278_vm10 = vcmp.eq.s32.totalorder %v270_v34, 0  ;;  %p513_p6 = scmp.ne.s32.totalorder %s511_s10, %s512_s15  ;;  %p517_p0 = scmp.lt.s32.totalorder %s511_s10, %s725_s2 }
  0x32   : > { %vm197_vm3 = vcmp.eq.s32.totalorder %v179_v8, 15  ;;  %vm193_vm4 = vcmp.eq.s32.totalorder %v179_v8, 0  ;;  %vm280_vm11 = vcmp.eq.s32.totalorder %v270_v34, 7  ;;  %v279_v45 = vsel %vm278_vm10, 0.0, %v566_v9  ;;  %p518_p1 = scmp.lt.s32.totalorder %s516_s24, %s512_s15 }
  0x33   : > { %217 = vrot.lane.b32.xlu1 %v164_v1, %s564_s27  ;;  %204 = vrot.lane.b32.xlu0 %v164_v1, %s565_s28  ;;  %v199_v14 = vsel %vm197_vm3, 0.0, %v566_v9  ;;  %v195_v15 = vsel %vm193_vm4, 0.0, %v566_v9  ;;  %v281_v49 = vsel %vm280_vm11, 0.0, %v566_v9  ;;  %v307_v60 = vstv %s685_s30  ;;  %p514_p9 = pnand %p513_p6, %p637_p11 }
  0x34   : > { %p519_p3 = por %p518_p1, %p517_p0 }
  0x35   : > { %p515_p13 = pneg %p514_p9 }
  0x37   : > { %p520_p4 = pnand %p519_p3, %p515_p13 }
  0x9d   : > { %v216_v6 = vpop.permute.xlu1 %215  ;;  %v203_v7 = vpop.permute.xlu0 %202 }
  0x9e   : > { %v210_v11 = vsel %vm206_vm1, 0.0, %v203_v7 }
  0x9f   : > { %v211_v12 = vmul.f32 %v210_v11, %v194_v10 }
  0xa1   : > { %v213_v21 = vadd.f32 %v211_v12, %v163_v0 }
  0xa5   : > { %v218_v16 = vpop.permute.xlu1 %217  ;;  %v205_v17 = vpop.permute.xlu0 %204 }
  0xa6   : > { %v220_v18 = vsel %vm219_vm5, %v216_v6, %v218_v16  ;;  %v223_v19 = vsel %vm219_vm5, %v218_v16, 0.0  ;;  %v207_v20 = vsel %vm206_vm1, %v203_v7, %v205_v17 }
  0xa7   : > { %v224_v22 = vmul.f32 %v220_v18, %v198_v13  ;;  %v225_v23 = vmul.f32 %v223_v19, %v199_v14  ;;  %v212_v24 = vmul.f32 %v207_v20, %v195_v15 }
  0xa9   : > { %v214_v25 = vadd.f32 %v212_v24, %v164_v1  ;;  %v226_v26 = vadd.f32 %v224_v22, %v213_v21 }
  0xab   : > { %251 = vrot.lane.b32.xlu1 %v226_v26, %s567_s21  ;;  %238 = vrot.lane.b32.xlu2 %v226_v26, %s568_s29  ;;  %v227_v27 = vadd.f32 %v225_v23, %v214_v25 }
  0xad   : > { %253 = vrot.lane.b32.xlu0 %v227_v27, %s567_s21 }
  0xb3   : > { %240 = vrot.lane.b32.xlu2 %v227_v27, %s568_s29 }
 0x105   : > { %v239_v28 = vpop.permute.xlu2 %238 }
 0x106   : > { %v246_v30 = vsel %vm242_vm7, 0.0, %v239_v28 }
 0x107   : > { %v247_v32 = vmul.f32 %v246_v30, %v230_v29 }
 0x109   : > { %v249_v38 = vadd.f32 %v247_v32, %v226_v26 }
 0x10d   : > { %v241_v33 = vpop.permute.xlu2 %240 }
 0x10e   : > { %v243_v35 = vsel %vm242_vm7, %v239_v28, %v241_v33 }
 0x10f   : > { %v250_v42 = vadd.f32 %v243_v35, %v227_v27 }
 0x11d   : > { %v252_v37 = vpop.permute.xlu1 %251 }
 0x11f   : > { %v254_v39 = vpop.permute.xlu0 %253 }
 0x120   : > { %v256_v40 = vsel %vm255_vm9, %v252_v37, %v254_v39  ;;  %v259_v41 = vsel %vm255_vm9, %v254_v39, 0.0 }
 0x121   : > { %v261_v43 = vmul.f32 %v259_v41, %v235_v36  ;;  %v262_v44 = vadd.f32 %v256_v40, %v249_v38 }
 0x123   : > { %v263_v46 = vadd.f32 %v261_v43, %v250_v42  ;;  %v284_v47 = vrot.slane %v262_v44, 7  ;;  %v295_v48 = vrot.slane %v262_v44, 1 }
 0x125   : > { %v285_v50 = vrot.slane %v263_v46, 7  ;;  %v289_v51 = vsel %vm288_vm12, 0.0, %v284_v47  ;;  %v296_v52 = vrot.slane %v263_v46, 1  ;;  %v300_v53 = vsel %vm299_vm13, %v295_v48, 0.0 }
 0x126   : > { %v291_v54 = vmul.f32 %v289_v51, %v279_v45  ;;  %v302_v59 = vmul.f32 %v300_v53, %v281_v49 }
 0x127   : > { %v290_v55 = vsel %vm288_vm12, 0.0, %v285_v50  ;;  %v301_v56 = vsel %vm299_vm13, %v296_v52, 0.0 }
 0x128   : > { %v292_v57 = vmul.f32 %v290_v55, %v279_v45  ;;  %v293_v58 = vadd.f32 %v291_v54, %v262_v44  ;;  %v303_v62 = vmul.f32 %v301_v56, %v281_v49 }
 0x12a   : > { %v294_v61 = vadd.f32 %v292_v57, %v263_v46  ;;  %v304_v63 = vadd.f32 %v302_v59, %v293_v58 }
 0x12c   : > { %v305_v0 = vadd.f32 %v303_v62, %v294_v61  ;;  %v308_v1 = vmul.f32 %v307_v60, %v304_v63 }
 0x12e   : > { %v309_v2 = vmul.f32 %v307_v60, %v305_v0  ;;  %310 = vst [vmem:[%s162_s7] sm:$0xff] %v308_v1 }
 0x130   : > { %311 = vst [vmem:[%s162_s7 + $0x8] sm:$0xff] %v309_v2 }
 0x131   : > { %523 = shalt.err (!%p520_p4)
}
 0x132   : > { %417 = dma.vmem_to_hbm [thread:$0]  (%p637_p11), %s327_s8, 256, %s329_s0, %s313_s9  }
 0x133 PF: > { %s340_s20 = sand.u32 1, %s550_s11   ;;  %p731_p7 = scmp.ge.s32.totalorder %s562_s14, 2 }
 0x134   : > { %s341_s27 = scalar_lea.sflag [#allocation5], %s340_s20 }
 0x135   : > { %p424_p5 = pnand %p731_p7, %p641_p12 }
 0x137   : > { %p425_p8 = pneg %p424_p5 }
 0x139   : > { %545 = dma.done.wait (%p425_p8), %s341_s27, 256  }
 0x13a   : > { %547 = vsyncadd (%p425_p8), %s341_s27, 4294967040  ;;  %p16_p10 = scmp.ge.s32.totalorder %s612_s16, 4   ;;  %s732_s11 = smov %s554_s12 }
 0x13b   : > { %s733_s12 = smov %s558_s13  ;;  %s734_s13 = smov %s624_s19 }
 0x13c   : > { %s735_s14 = smov %s612_s16  ;;  %18 = sbr.rel (!%p16_p10) target bundleno = 7 (0x7), region = 73 }
 0x141   :  { %347 = vsyncpa [#allocation4], 1 }
 0x142   :  { %349 = vsyncpa [#allocation4 + $0x1], 1 }
 0x143   :  { %350 = vsyncpa [#allocation5], 1 }
 0x144   :  { %352 = vsyncpa [#allocation5 + $0x1], 1 }

</bundles_post_ra>
